<compile_context>
chip_gen: v5e
topology: v5e:2x2
jax: 0.10.0
libtpu: 0.0.40
codegen_flags: <defaults>
</compile_context>

<pallas_src>
import functools

import jax
import jax.numpy as jnp
from jax.experimental import pallas as pl
from jax.experimental.pallas import tpu as pltpu


# --------------------------------- tiling helper ---------------------------------
def _pick_tile(dim, target, mult):
    """Largest multiple of `mult` that divides `dim` and is <= target, else the full dim."""
    if dim <= target:
        return dim
    t = (target // mult) * mult
    while t >= mult:
        if dim % t == 0:
            return t
        t -= mult
    return dim


# ----------------------- tiled, K-accumulating matmul kernel -----------------------
def _matmul_kernel(x_ref, w_ref, o_ref, acc_ref):
    @pl.when(pl.program_id(2) == 0)
    def _():
        acc_ref[...] = jnp.zeros_like(acc_ref)

    acc_ref[...] += jnp.dot(
        x_ref[...], w_ref[...], preferred_element_type=jnp.float32
    )

    @pl.when(pl.program_id(2) == pl.num_programs(2) - 1)
    def _():
        o_ref[...] = acc_ref[...].astype(o_ref.dtype)


def pallas_matmul(x, w, *, tm_target=256, tn_target=256, tk_target=512):
    n, k = x.shape
    k2, m = w.shape
    assert k == k2
    tm = _pick_tile(n, tm_target, 8)
    tn = _pick_tile(m, tn_target, 128)
    tk = _pick_tile(k, tk_target, 128)
    grid = (n // tm, m // tn, k // tk)
    return pl.pallas_call(
        _matmul_kernel,
        out_shape=jax.ShapeDtypeStruct((n, m), x.dtype),
        grid=grid,
        in_specs=[
            pl.BlockSpec((tm, tk), lambda i, j, kk: (i, kk)),
            pl.BlockSpec((tk, tn), lambda i, j, kk: (kk, j)),
        ],
        out_specs=pl.BlockSpec((tm, tn), lambda i, j, kk: (i, j)),
        scratch_shapes=[pltpu.VMEM((tm, tn), jnp.float32)],
        compiler_params=pltpu.CompilerParams(
            dimension_semantics=("parallel", "parallel", "arbitrary"),
            vmem_limit_bytes=32 * 1024 * 1024,
        ),
    )(x, w)


# ------------------- fused relative-attention kernel (per batch) -------------------
def _rel_attn_kernel(wh_ref, rk_ref, rwb_ref, rrb_ref, o_ref, *, scale, n_head, d_head):
    # wh_ref: (qlen, 1, 3*n_head, d_head) -> rows [0,n) are q heads, [n,2n) k heads, [2n,3n) v
    wh = wh_ref[...]
    rk = rk_ref[...]          # (rlen, n_head, d_head)
    rwb = rwb_ref[...]        # (n_head, d_head)
    rrb = rrb_ref[...]        # (n_head, d_head)

    outs = []
    for h in range(n_head):
        q = wh[:, 0, h, :]                    # (qlen, d_head)
        k = wh[:, 0, n_head + h, :]           # (klen, d_head)
        v = wh[:, 0, 2 * n_head + h, :]       # (klen, d_head)
        rk_h = rk[:, h, :]                    # (rlen, d_head)  (rlen == klen)
        rw = rwb[h:h + 1, :]                  # (1, d_head)
        rr = rrb[h:h + 1, :]                  # (1, d_head)

        # AC + BD fused into one MXU matmul with contraction 2*d_head; scale folded in.
        lhs = jnp.concatenate([q + rw, q + rr], axis=-1) * scale      # (qlen, 2*d_head)
        rhs = jnp.concatenate([k, rk_h], axis=-1)                     # (klen, 2*d_head)
        s = jax.lax.dot_general(
            lhs, rhs, (((1,), (1,)), ((), ())),
            preferred_element_type=jnp.float32,
        )                                                             # (qlen, klen)

        # softmax over the key axis; normalization deferred until after the PV matmul
        m = jnp.max(s, axis=-1, keepdims=True)
        p = jnp.exp(s - m)
        l = jnp.sum(p, axis=-1, keepdims=True)
        pv = jnp.dot(p.astype(v.dtype), v, preferred_element_type=jnp.float32)
        # approx=False keeps numerics tight; approx=True moves this to the EUP for speed.
        outs.append(pv * pl.reciprocal(l, approx=False))

    # single lane-dense (qlen, n_head*d_head) store
    o_ref[0] = jnp.concatenate(outs, axis=-1).astype(o_ref.dtype)


def pallas_rel_attention(w_heads4, r_head_k, r_w_bias, r_r_bias, scale, *, n_head, d_head):
    # w_heads4: (qlen, bsz, 3*n_head, d_head); r_head_k: (rlen, n_head, d_head)
    qlen, bsz = w_heads4.shape[0], w_heads4.shape[1]
    rlen = r_head_k.shape[0]
    kern = functools.partial(_rel_attn_kernel, scale=scale, n_head=n_head, d_head=d_head)
    return pl.pallas_call(
        kern,
        out_shape=jax.ShapeDtypeStruct((bsz, qlen, n_head * d_head), w_heads4.dtype),
        grid=(bsz,),
        in_specs=[
            pl.BlockSpec((qlen, 1, 3 * n_head, d_head), lambda b: (0, b, 0, 0)),
            pl.BlockSpec((rlen, n_head, d_head), lambda b: (0, 0, 0)),
            pl.BlockSpec((n_head, d_head), lambda b: (0, 0)),
            pl.BlockSpec((n_head, d_head), lambda b: (0, 0)),
        ],
        out_specs=pl.BlockSpec((1, qlen, n_head * d_head), lambda b: (b, 0, 0)),
        compiler_params=pltpu.CompilerParams(
            dimension_semantics=("parallel",),
            vmem_limit_bytes=32 * 1024 * 1024,
        ),
    )(w_heads4, r_head_k, r_w_bias, r_r_bias)


# ------------------------- row-tiled (residual +) LayerNorm -------------------------
def _add_layernorm_kernel(x_ref, res_ref, g_ref, b_ref, o_ref, *, eps):
    y = x_ref[...] + res_ref[...]
    mean = jnp.mean(y, axis=-1, keepdims=True)
    var = jnp.mean(jnp.square(y - mean), axis=-1, keepdims=True)
    o_ref[...] = ((y - mean) * jax.lax.rsqrt(var + eps)) * g_ref[...] + b_ref[...]


def _layernorm_kernel(x_ref, g_ref, b_ref, o_ref, *, eps):
    y = x_ref[...]
    mean = jnp.mean(y, axis=-1, keepdims=True)
    var = jnp.mean(jnp.square(y - mean), axis=-1, keepdims=True)
    o_ref[...] = ((y - mean) * jax.lax.rsqrt(var + eps)) * g_ref[...] + b_ref[...]


def pallas_add_layernorm(x, res, gamma, beta, eps=1e-5):
    n, d = x.shape
    tm = _pick_tile(n, 512, 8)
    g = gamma.reshape(1, d)
    b = beta.reshape(1, d)
    kern = functools.partial(_add_layernorm_kernel, eps=eps)
    return pl.pallas_call(
        kern,
        out_shape=jax.ShapeDtypeStruct((n, d), x.dtype),
        grid=(n // tm,),
        in_specs=[
            pl.BlockSpec((tm, d), lambda i: (i, 0)),
            pl.BlockSpec((tm, d), lambda i: (i, 0)),
            pl.BlockSpec((1, d), lambda i: (0, 0)),
            pl.BlockSpec((1, d), lambda i: (0, 0)),
        ],
        out_specs=pl.BlockSpec((tm, d), lambda i: (i, 0)),
        compiler_params=pltpu.CompilerParams(dimension_semantics=("parallel",)),
    )(x, res, g, b)


def pallas_layernorm(x, gamma, beta, eps=1e-5):
    n, d = x.shape
    tm = _pick_tile(n, 512, 8)
    g = gamma.reshape(1, d)
    b = beta.reshape(1, d)
    kern = functools.partial(_layernorm_kernel, eps=eps)
    return pl.pallas_call(
        kern,
        out_shape=jax.ShapeDtypeStruct((n, d), x.dtype),
        grid=(n // tm,),
        in_specs=[
            pl.BlockSpec((tm, d), lambda i: (i, 0)),
            pl.BlockSpec((1, d), lambda i: (0, 0)),
            pl.BlockSpec((1, d), lambda i: (0, 0)),
        ],
        out_specs=pl.BlockSpec((tm, d), lambda i: (i, 0)),
        compiler_params=pltpu.CompilerParams(dimension_semantics=("parallel",)),
    )(x, g, b)


# --------------------------------- forward wrapper ---------------------------------
def rel_partial_mha_forward(w, r, r_w_bias, r_r_bias, params, *,
                            n_head, d_head, pre_lnorm=False):
    qlen, bsz, d_model = w.shape
    rlen = r.shape[0]
    scale = 1.0 / (d_head ** 0.5)

    w_flat = w.reshape(qlen * bsz, d_model)

    if pre_lnorm:
        ln_in = pallas_layernorm(w_flat, params["ln_gamma"], params["ln_beta"])
        w_heads = pallas_matmul(ln_in, params["qkv_w"])
    else:
        w_heads = pallas_matmul(w_flat, params["qkv_w"])       # (qlen*bsz, 3*n_head*d_head)
    r_head_k = pallas_matmul(r, params["r_w"])                  # (rlen, n_head*d_head)

    # Pure metadata reshapes; per-batch / per-head views are selected by BlockSpec
    # index maps inside the attention kernel (no transposed q/k/v copies in HBM).
    w_heads4 = w_heads.reshape(qlen, bsz, 3 * n_head, d_head)
    r_head_k3 = r_head_k.reshape(rlen, n_head, d_head)

    attn_bh = pallas_rel_attention(
        w_heads4, r_head_k3, r_w_bias, r_r_bias, scale, n_head=n_head, d_head=d_head
    )                                                           # (bsz, qlen, n_head*d_head)

    # back to sequence-major row order for o_net / residual / LN
    attn_vec = jnp.transpose(attn_bh, (1, 0, 2)).reshape(qlen * bsz, n_head * d_head)

    attn_out = pallas_matmul(attn_vec, params["o_w"])           # (qlen*bsz, d_model)
    # TODO(synk): dropout / dropatt are identity (eval mode); attn_mask=None path only.

    if pre_lnorm:
        out = w_flat + attn_out
    else:
        out = pallas_add_layernorm(
            attn_out, w_flat, params["ln_gamma"], params["ln_beta"]
        )
    return out.reshape(qlen, bsz, d_model)


# ------------------------------- pure-JAX reference -------------------------------
def reference_forward(w, r, r_w_bias, r_r_bias, params, *,
                      n_head, d_head, pre_lnorm=False):
    qlen, bsz, d_model = w.shape
    rlen = r.shape[0]
    scale = 1.0 / (d_head ** 0.5)

    def ln(x):
        m = jnp.mean(x, -1, keepdims=True)
        v = jnp.mean((x - m) ** 2, -1, keepdims=True)
        return (x - m) / jnp.sqrt(v + 1e-5) * params["ln_gamma"] + params["ln_beta"]

    x = ln(w) if pre_lnorm else w
    w_heads = x @ params["qkv_w"]
    r_head_k = r @ params["r_w"]
    w_heads = w_heads.reshape(qlen, bsz, 3, n_head, d_head)
    q, k, v = w_heads[:, :, 0], w_heads[:, :, 1], w_heads[:, :, 2]
    r_head_k = r_head_k.reshape(rlen, n_head, d_head)
    AC = jnp.einsum("ibnd,jbnd->ijbn", q + r_w_bias, k)
    BD = jnp.einsum("ibnd,jnd->ijbn", q + r_r_bias, r_head_k)
    score = (AC + BD) * scale
    prob = jax.nn.softmax(score, axis=1)
    vec = jnp.einsum("ijbn,jbnd->ibnd", prob, v)
    vec = vec.reshape(qlen, bsz, n_head * d_head)
    attn_out = vec @ params["o_w"]
    if pre_lnorm:
        return w + attn_out
    return ln(w + attn_out)


if __name__ == "__main__":
    # Small config consistent with the module: d_model = n_head * d_head
    n_head, d_head = 4, 32
    d_model = n_head * d_head          # 128 (lane-dense)
    qlen, bsz = 16, 2
    rlen = qlen                        # no _rel_shift in this forward -> rlen must equal klen

    key = jax.random.PRNGKey(0)
    ks = jax.random.split(key, 8)
    params = {
        "qkv_w": 0.1 * jax.random.normal(ks[0], (d_model, 3 * n_head * d_head), jnp.float32),
        "r_w":   0.1 * jax.random.normal(ks[1], (d_model, n_head * d_head), jnp.float32),
        "o_w":   0.1 * jax.random.normal(ks[2], (n_head * d_head, d_model), jnp.float32),
        "ln_gamma": 1.0 + 0.1 * jax.random.normal(ks[3], (d_model,), jnp.float32),
        "ln_beta":  0.1 * jax.random.normal(ks[4], (d_model,), jnp.float32),
    }
    w = jax.random.normal(ks[5], (qlen, bsz, d_model), jnp.float32)
    r = jax.random.normal(ks[6], (rlen, d_model), jnp.float32)
    r_w_bias = 0.1 * jax.random.normal(ks[7], (n_head, d_head), jnp.float32)
    r_r_bias = 0.1 * jax.random.normal(jax.random.PRNGKey(123), (n_head, d_head), jnp.float32)

    out = rel_partial_mha_forward(
        w, r, r_w_bias, r_r_bias, params, n_head=n_head, d_head=d_head, pre_lnorm=False
    )
    out = jax.block_until_ready(out)

    ref = reference_forward(
        w, r, r_w_bias, r_r_bias, params, n_head=n_head, d_head=d_head, pre_lnorm=False
    )
    assert out.shape == (qlen, bsz, d_model)
    assert jnp.allclose(out, ref, atol=1e-4, rtol=1e-4), (
        f"max abs err = {jnp.max(jnp.abs(out - ref))}"
    )
    print("KERNEL_OK")
</pallas_src>

<mosaic_0001>
module attributes {stable_mosaic.version = 11 : i64} {
  func.func @_matmul_kernel(%arg0: i32, %arg1: i32, %arg2: i32, %arg3: memref<32x128xf32, #tpu.memory_space<vmem>>, %arg4: memref<128x128xf32, #tpu.memory_space<vmem>>, %arg5: memref<32x128xf32, #tpu.memory_space<vmem>>, %arg6: memref<32x128xf32, #tpu.memory_space<vmem>>) attributes {dimension_semantics = [#tpu.dimension_semantics<parallel>, #tpu.dimension_semantics<parallel>, #tpu.dimension_semantics<arbitrary>], iteration_bounds = array<i64: 1, 3, 1>, scalar_prefetch = 0 : i64, scratch_operands = 1 : i64, tpu.core_type = #tpu.core_type<tc>, window_params = [{transform_indices = @transform_0, window_bounds = array<i64: 32, 128>}, {transform_indices = @transform_1, window_bounds = array<i64: 128, 128>}, {transform_indices = @transform_2, window_bounds = array<i64: 32, 128>}]} {
    %c0_i32 = arith.constant 0 : i32
    %0 = arith.cmpi eq, %arg2, %c0_i32 : i32
    %1 = arith.extui %0 : i1 to i32
    %c0_i32_0 = arith.constant 0 : i32
    %2 = arith.cmpi ne, %1, %c0_i32_0 : i32
    scf.if %2 {
      %cst_10 = arith.constant 0.000000e+00 : f32
      %12 = vector.broadcast %cst_10 : f32 to vector<32x128xf32>
      %c0_11 = arith.constant 0 : index
      %c0_12 = arith.constant 0 : index
      %13 = vector.load %arg6[%c0_11, %c0_12] : memref<32x128xf32, #tpu.memory_space<vmem>>, vector<32x128xf32>
      tpu.vector_store %arg6[%c0_11, %c0_12], %12 {strides = array<i32>} : memref<32x128xf32, #tpu.memory_space<vmem>>, vector<32x128xf32>,
    } else {
    }
    %c0 = arith.constant 0 : index
    %c0_1 = arith.constant 0 : index
    %3 = vector.load %arg6[%c0, %c0_1] : memref<32x128xf32, #tpu.memory_space<vmem>>, vector<32x128xf32>
    %c0_2 = arith.constant 0 : index
    %c0_3 = arith.constant 0 : index
    %4 = vector.load %arg3[%c0_2, %c0_3] : memref<32x128xf32, #tpu.memory_space<vmem>>, vector<32x128xf32>
    %c0_4 = arith.constant 0 : index
    %c0_5 = arith.constant 0 : index
    %5 = vector.load %arg4[%c0_4, %c0_5] : memref<128x128xf32, #tpu.memory_space<vmem>>, vector<128x128xf32>
    %cst = arith.constant dense<0.000000e+00> : vector<32x128xf32>
    %6 = tpu.matmul %4, %5, %cst {dimension_numbers = #tpu.dot_dimension_numbers<[1], [0], [0], [1], [0, 0, 1, 1], [], []>} : vector<32x128xf32>, vector<128x128xf32>, vector<32x128xf32> -> vector<32x128xf32>
    %7 = arith.addf %3, %6 : vector<32x128xf32>
    %c0_6 = arith.constant 0 : index
    %c0_7 = arith.constant 0 : index
    %8 = vector.load %arg6[%c0_6, %c0_7] : memref<32x128xf32, #tpu.memory_space<vmem>>, vector<32x128xf32>
    tpu.vector_store %arg6[%c0_6, %c0_7], %7 {strides = array<i32>} : memref<32x128xf32, #tpu.memory_space<vmem>>, vector<32x128xf32>,
    %c0_i32_8 = arith.constant 0 : i32
    %9 = arith.cmpi eq, %arg2, %c0_i32_8 : i32
    %10 = arith.extui %9 : i1 to i32
    %c0_i32_9 = arith.constant 0 : i32
    %11 = arith.cmpi ne, %10, %c0_i32_9 : i32
    scf.if %11 {
      %c0_10 = arith.constant 0 : index
      %c0_11 = arith.constant 0 : index
      %12 = vector.load %arg6[%c0_10, %c0_11] : memref<32x128xf32, #tpu.memory_space<vmem>>, vector<32x128xf32>
      %c0_12 = arith.constant 0 : index
      %c0_13 = arith.constant 0 : index
      %13 = vector.load %arg5[%c0_12, %c0_13] : memref<32x128xf32, #tpu.memory_space<vmem>>, vector<32x128xf32>
      tpu.vector_store %arg5[%c0_12, %c0_13], %12 {strides = array<i32>} : memref<32x128xf32, #tpu.memory_space<vmem>>, vector<32x128xf32>,
    } else {
    }
    return
  }
  func.func @transform_0(%arg0: i32, %arg1: i32, %arg2: i32) -> (i32, i32) {
    %c0_i32 = arith.constant 0 : i32
    return %arg0, %arg2 : i32, i32
  }
  func.func @transform_1(%arg0: i32, %arg1: i32, %arg2: i32) -> (i32, i32) {
    %c0_i32 = arith.constant 0 : i32
    return %arg2, %arg1 : i32, i32
  }
  func.func @transform_2(%arg0: i32, %arg1: i32, %arg2: i32) -> (i32, i32) {
    %c0_i32 = arith.constant 0 : i32
    return %arg0, %arg1 : i32, i32
  }
}

</mosaic_0001>

<bundles_post_ra>
// kernel: tpu_custom_call.1
= control target key start
LH: loop header
LB: loop body
LE: loop exit
PB: predicated region body
PF: predicated region fallthrough
CT: control target
= control target key end

     0   :  { %7 = vsyncpa [#allocation4], 0  ;;  %s905_s0 = inlined_call_operand.hbm [shape: f32[32,128], index: 0, kind: input, shape index: {}]   ;;  %s906_s1 = inlined_call_operand.hbm [shape: f32[128,384], index: 1, kind: input, shape index: {}]   ;;  %s907_s2 = inlined_call_operand.hbm [shape: f32[32,384], index: 2, kind: output, shape index: {}]  }
   0x1   :  { %8 = vsyncpa [#allocation7], 0 }
   0x2   :  { %10 = vsyncpa [#allocation7 + $0x1], 0 }
   0x3   :  { %11 = vsyncpa [#allocation5], 0 }
   0x4   :  { %13 = vsyncpa [#allocation5 + $0x1], 0  ;;  %s734_s9 = smov 0   ;;  %s736_s10 = smov 0  }
   0x5   :  { %s738_s11 = smov 0   ;;  %s740_s12 = smov 0  }
   0x6   :  { %s742_s13 = smov 0   ;;  %s744_s14 = smov 0  }
   0x7 LB: > { %s422_s15 = sadd.s32 4294967295, %s710_s14   ;;  %s423_s16 = sadd.s32 4294967294, %s710_s14   ;;  %s710_s14 = sphi %s744_s14, %s19_s14   ;;  %s706_s13 = sphi %s742_s13, %s921_s13   ;;  %s702_s12 = sphi %s740_s12, %s920_s12   ;;  %s698_s11 = sphi %s738_s11, %s919_s11   ;;  %s694_s10 = sphi %s736_s10, %s918_s10   ;;  %s690_s9 = sphi %s734_s9, %s917_s9  }
   0x8   : > { %p88_p0 = scmp.ne.s32.totalorder %s694_s10, %s690_s9  ;;  %p768_p1 = scmp.eq.s32.totalorder %s422_s15, 0 }
   0x9   : > { %p772_p2 = scmp.eq.s32.totalorder %s422_s15, 2  ;;  %p120_p3 = scmp.eq.s32.totalorder %s423_s16, 2 }
   0xa   : > { %p778_p4 = por %p768_p1, %p88_p0  ;;  %p424_p5 = scmp.ge.s32.totalorder %s710_s14, 1 }
   0xb   : > { %p783_p6 = por %p120_p3, %p88_p0  ;;  %p127_p7 = scmp.lt.s32.totalorder %s710_s14, 4 }
   0xc   : > { %s142_s23 = sshll.u32 %s905_s0, 4  ;;  %s712_s25 = smov [#allocation3]   ;;  %s143_s23 = int_to_ptr.hbm [resolvable:$true] %s142_s23 }
   0xd   : > { %p791_p8 = pnand %p424_p5, %p127_p7  ;;  %s144_s26 = sshll.u32 %s712_s25, 4  ;;  %s145_s26 = int_to_ptr.vmem [resolvable:$true] %s144_s26 }
   0xe   : > { %s908_s27 = smov 128   ;;  %s714_s28 = smov 8  }
   0xf   : > { %p493_p9 = pneg %p791_p8  ;;  %s34_s29 = sadd.s32 1, %s706_s13 }
  0x10   : > { %p36_p11 = scmp.ge.s32.totalorder %s34_s29, 3  ;;  %s75_s30 = sadd.s32 1, %s698_s11 }
  0x11   : > { %p494_p10 = pnand %p493_p9, %p768_p1  ;;  %p82_p12 = scmp.ne.s32.totalorder %s698_s11, %s694_s10 }
  0x12   : > { %p83_p13 = scmp.eq.s32.totalorder %s710_s14, 0  ;;  %s923_s29 = smov (%p36_p11, %s34_s29), 0 }
  0x13   : > { %496 = dma.hbm_to_vmem [thread:$0]  (!%p494_p10), %s143_s23, 512, %s145_s26, [#allocation4], %s908_s27, %s908_s27, %s714_s28  }
  0x14   : > { %p809_p0 = por %p83_p13, %p82_p12  ;;  %p815_p3 = por %p772_p2, %p82_p12 }
  0x15   : > { %s71_s5 = ssub.s32 %s706_s13, %s923_s29  ;;  %p506_p5 = scmp.lt.s32.totalorder %s710_s14, 3 }
  0x16   : > { %p73_p7 = scmp.eq.s32.totalorder %s71_s5, 0  ;;  %s158_s6 = sand.u32 1, %s698_s11  }
  0x17   : > { %s427_s7 = sshll.u32 %s158_s6, 7  ;;  %s428_s15 = sshll.u32 %s706_s13, 3 }
  0x18   : > { %s824_s8 = scalar_select %p73_p7, %s698_s11, %s75_s30  }
  0x19   : > { %s169_s22 = scalar_lea.hbm %s906_s1, %s428_s15  ;;  %s162_s23 = scalar_lea.vmem [#allocation6], %s427_s7 }
  0x1a   : > { %s172_s25 = sshll.u32 %s162_s23, 4  ;;  %s170_s18 = sshll.u32 %s169_s22, 4  ;;  %s173_s25 = int_to_ptr.vmem [resolvable:$true] %s172_s25  ;;  %s171_s18 = int_to_ptr.hbm [resolvable:$true] %s170_s18 }
  0x1b   : > { %p498_p2 = pnand %p506_p5, %p809_p0  ;;  %s159_s26 = scalar_lea.sflag [#allocation7], %s158_s6 }
  0x1c   : > { %s715_s27 = smov 384   ;;  %s916_s5 = smov 128  }
  0x1d   : > { %500 = dma.hbm_to_vmem [thread:$0]  (!%p498_p2), %s171_s18, 2048, %s173_s25, %s159_s26, %s715_s27, %s916_s5, %s714_s28  }
  0x1e   : > { %184 = sbr.rel (%p791_p8) target bundleno = 210 (0xd2), region = 28 }
  0x23   : > { %677 = dma.done.wait (%p768_p1), [#allocation4], 512  }
  0x24   : > { %679 = vsyncadd (%p768_p1), [#allocation4], 4294966784  ;;  %s841_s30 = sand.u32 1, %s694_s10  }
  0x25   : > { %s431_s3 = sshll.u32 %s841_s30, 7  ;;  %s192_s6 = scalar_lea.sflag [#allocation7], %s841_s30 }
  0x26   : > { %s845_s7 = scalar_lea.vmem [#allocation6], %s431_s3 }
  0x27   : > { %681 = dma.done.wait (%p778_p4), %s192_s6, 2048  }
  0x28   : > { %683 = vsyncadd (%p778_p4), %s192_s6, 4294965248  ;;  %v251_v0 = vld [vmem:[%s845_s7 + $0x78] sm:$0xff]  ;;  %v250_v1 = vld [vmem:[%s845_s7 + $0x70] sm:$0xff]  ;;  %s432_s17 = sshll.u32 %s841_s30, 5  ;;  %s434_s19 = sshll.u32 %s702_s12, 3 }
  0x29   : > { %438 = vmatpush.msra.mxu2 %v251_v0  ;;  %439 = vmatpush.msra.mxu3 %v251_v0  ;;  %v249_v2 = vld [vmem:[%s845_s7 + $0x68] sm:$0xff]  ;;  %v248_v3 = vld [vmem:[%s845_s7 + $0x60] sm:$0xff]  ;;  %v247_v4 = vld [vmem:[%s845_s7 + $0x58] sm:$0xff]  ;;  %s314_s28 = scalar_lea.hbm %s907_s2, %s434_s19  ;;  %s216_s15 = scalar_lea.vmem [#allocation8], %s432_s17 }
  0x2a   : > { %252 = vmatpush.msra.mxu0 %v251_v0  ;;  %437 = vmatpush.msra.mxu1 %v251_v0  ;;  %v246_v5 = vld [vmem:[%s845_s7 + $0x50] sm:$0xff]  ;;  %v245_v6 = vld [vmem:[%s845_s7 + $0x48] sm:$0xff]  ;;  %v244_v7 = vld [vmem:[%s845_s7 + $0x40] sm:$0xff]  ;;  %s315_s16 = sshll.u32 %s216_s15, 4  ;;  %s317_s21 = sshll.u32 %s314_s28, 4  ;;  %s316_s16 = int_to_ptr.vmem [resolvable:$true] %s315_s16  ;;  %s318_s21 = int_to_ptr.hbm [resolvable:$true] %s317_s21 }
  0x2b   : > { %441 = vmatpush.msra.mxu2 %v250_v1  ;;  %442 = vmatpush.msra.mxu3 %v250_v1  ;;  %v243_v8 = vld [vmem:[%s845_s7 + $0x38] sm:$0xff]  ;;  %v242_v9 = vld [vmem:[%s845_s7 + $0x30] sm:$0xff]  ;;  %v241_v10 = vld [vmem:[%s845_s7 + $0x28] sm:$0xff]  ;;  %s301_s22 = scalar_lea.sflag [#allocation5], %s841_s30  ;;  %s638_s12 = sshra.s32 %s318_s21, 4  ;;  %s639_s12 = int_to_ptr.hbm [resolvable:$true] %s638_s12 }
  0x2c   : > { %253 = vmatpush.msra.mxu0 %v250_v1  ;;  %440 = vmatpush.msra.mxu1 %v250_v1  ;;  %v240_v11 = vld [vmem:[%s845_s7 + $0x20] sm:$0xff]  ;;  %v239_v12 = vld [vmem:[%s845_s7 + $0x18] sm:$0xff]  ;;  %v238_v13 = vld [vmem:[%s845_s7 + $0x10] sm:$0xff]  ;;  %s640_s23 = scalar_lea.hbm %s639_s12, 32  ;;  %s644_s26 = scalar_lea.hbm %s907_s2, 96 }
  0x2d   : > { %444 = vmatpush.msra.mxu2 %v249_v2  ;;  %445 = vmatpush.msra.mxu3 %v249_v2  ;;  %v237_v14 = vld [vmem:[%s845_s7 + $0x8] sm:$0xff]  ;;  %v236_v15 = vld [vmem:[%s845_s7] sm:$0xff]  ;;  %v234_v16 = vld [vmem:[#allocation3 + $0x10] sm:$0xff]  ;;  %p641_p1 = scmp.ne.s32.totalorder %s639_s12, %s640_s23  ;;  %p645_p9 = scmp.lt.s32.totalorder %s639_s12, %s907_s2 }
  0x2e   : > { %254 = vmatpush.msra.mxu0 %v249_v2  ;;  %443 = vmatpush.msra.mxu1 %v249_v2  ;;  %v235_v17 = vld [vmem:[#allocation3 + $0x18] sm:$0xff]  ;;  %v232_v18 = vld [vmem:[#allocation3] sm:$0xff]  ;;  %v233_v19 = vld [vmem:[#allocation3 + $0x8] sm:$0xff]  ;;  %p646_p10 = scmp.lt.s32.totalorder %s644_s26, %s640_s23 }
  0x2f   : > { %447 = vmatpush.msra.mxu2 %v248_v3  ;;  %448 = vmatpush.msra.mxu3 %v248_v3  ;;  %p642_p4 = pnand %p641_p1, %p815_p3 }
  0x30   : > { %255 = vmatpush.msra.mxu0 %v248_v3  ;;  %446 = vmatpush.msra.mxu1 %v248_v3  ;;  %p647_p11 = por %p646_p10, %p645_p9 }
  0x31   : > { %450 = vmatpush.msra.mxu2 %v247_v4  ;;  %451 = vmatpush.msra.mxu3 %v247_v4  ;;  %p643_p8 = pneg %p642_p4 }
  0x32   : > { %256 = vmatpush.msra.mxu0 %v247_v4  ;;  %449 = vmatpush.msra.mxu1 %v247_v4 }
  0x33   : > { %453 = vmatpush.msra.mxu2 %v246_v5  ;;  %454 = vmatpush.msra.mxu3 %v246_v5  ;;  %p648_p12 = pnand %p647_p11, %p643_p8 }
  0x34   : > { %257 = vmatpush.msra.mxu0 %v246_v5  ;;  %452 = vmatpush.msra.mxu1 %v246_v5 }
  0x35   : > { %456 = vmatpush.msra.mxu2 %v245_v6  ;;  %457 = vmatpush.msra.mxu3 %v245_v6 }
  0x36   : > { %258 = vmatpush.msra.mxu0 %v245_v6  ;;  %455 = vmatpush.msra.mxu1 %v245_v6 }
  0x37   : > { %459 = vmatpush.msra.mxu2 %v244_v7  ;;  %460 = vmatpush.msra.mxu3 %v244_v7 }
  0x38   : > { %259 = vmatpush.msra.mxu0 %v244_v7  ;;  %458 = vmatpush.msra.mxu1 %v244_v7 }
  0x39   : > { %462 = vmatpush.msra.mxu2 %v243_v8  ;;  %463 = vmatpush.msra.mxu3 %v243_v8 }
  0x3a   : > { %260 = vmatpush.msra.mxu0 %v243_v8  ;;  %461 = vmatpush.msra.mxu1 %v243_v8 }
  0x3b   : > { %465 = vmatpush.msra.mxu2 %v242_v9  ;;  %466 = vmatpush.msra.mxu3 %v242_v9 }
  0x3c   : > { %261 = vmatpush.msra.mxu0 %v242_v9  ;;  %464 = vmatpush.msra.mxu1 %v242_v9 }
  0x3d   : > { %468 = vmatpush.msra.mxu2 %v241_v10  ;;  %469 = vmatpush.msra.mxu3 %v241_v10 }
  0x3e   : > { %262 = vmatpush.msra.mxu0 %v241_v10  ;;  %467 = vmatpush.msra.mxu1 %v241_v10 }
  0x3f   : > { %471 = vmatpush.msra.mxu2 %v240_v11  ;;  %472 = vmatpush.msra.mxu3 %v240_v11 }
  0x40   : > { %263 = vmatpush.msra.mxu0 %v240_v11  ;;  %470 = vmatpush.msra.mxu1 %v240_v11 }
  0x41   : > { %474 = vmatpush.msra.mxu2 %v239_v12  ;;  %475 = vmatpush.msra.mxu3 %v239_v12 }
  0x42   : > { %264 = vmatpush.msra.mxu0 %v239_v12  ;;  %473 = vmatpush.msra.mxu1 %v239_v12 }
  0x43   : > { %477 = vmatpush.msra.mxu2 %v238_v13  ;;  %478 = vmatpush.msra.mxu3 %v238_v13 }
  0x44   : > { %265 = vmatpush.msra.mxu0 %v238_v13  ;;  %476 = vmatpush.msra.mxu1 %v238_v13 }
  0x45   : > { %480 = vmatpush.msra.mxu2 %v237_v14  ;;  %481 = vmatpush.msra.mxu3 %v237_v14 }
  0x46   : > { %266 = vmatpush.msra.mxu0 %v237_v14  ;;  %479 = vmatpush.msra.mxu1 %v237_v14 }
  0x47   : > { %483 = vmatpush.msra.mxu2 %v236_v15  ;;  %484 = vmatpush.msra.mxu3 %v236_v15 }
  0x48   : > { %274 = vmatmul.f32.vlgmr.msra.gmra.mxu2 %v234_v16  ;;  %277 = vmatmul.f32.vlgmr.msra.gmra.mxu3 %v235_v17 }
  0x49   : > { %267 = vmatpush.msra.mxu0 %v236_v15  ;;  %482 = vmatpush.msra.mxu1 %v236_v15 }
  0x4a   : > { %268 = vmatmul.f32.vlgmr.msra.gmra.mxu0 %v232_v18  ;;  %271 = vmatmul.f32.vlgmr.msra.gmra.mxu1 %v233_v19 }
  0xc7   : > { %v269_v20 = vpop.f32.mrf.mxu0  ;;  %v272_v21 = vpop.f32.mrf.mxu1 }
  0xc8   : > { %296 = vst [vmem:[%s216_s15] sm:$0xff] %v269_v20 }
  0xc9   : > { %297 = vst [vmem:[%s216_s15 + $0x8] sm:$0xff] %v272_v21 }
  0xcb   : > { %v275_v22 = vpop.f32.mrf.mxu2  ;;  %v278_v23 = vpop.f32.mrf.mxu3 }
  0xcc   : > { %298 = vst [vmem:[%s216_s15 + $0x10] sm:$0xff] %v275_v22 }
  0xcd   : > { %299 = vst [vmem:[%s216_s15 + $0x18] sm:$0xff] %v278_v23 }
  0xce   : > { %651 = shalt.err (!%p648_p12)
}
  0xcf   : > { %s716_s30 = smov 128   ;;  %s717_s6 = smov 384  }
  0xd0   : > { %s718_s7 = smov 8  }
  0xd1   : > { %491 = dma.vmem_to_hbm [thread:$0]  (%p815_p3), %s316_s16, 512, %s318_s21, %s301_s22, %s716_s30, %s717_s6, %s718_s7  }
  0xd2 PF: > { %p508_p13 = scmp.ge.s32.totalorder %s710_s14, 2  ;;  %s332_s17 = sand.u32 1, %s690_s9  }
  0xd3   : > { %s333_s19 = scalar_lea.sflag [#allocation5], %s332_s17 }
  0xd4   : > { %p502_p0 = pnand %p508_p13, %p783_p6 }
  0xd6   : > { %p503_p5 = pneg %p502_p0 }
  0xd8   : > { %685 = dma.done.wait (%p503_p5), %s333_s19, 512  }
  0xd9   : > { %687 = vsyncadd (%p503_p5), %s333_s19, 4294966784  ;;  %s19_s14 = sadd.s32 1, %s710_s14   ;;  %s917_s9 = smov %s694_s10 }
  0xda   : > { %p16_p7 = scmp.ge.s32.totalorder %s19_s14, 5   ;;  %s918_s10 = smov %s698_s11 }
  0xdb   : > { %s919_s11 = smov %s824_s8  ;;  %s920_s12 = smov %s706_s13 }
  0xdc   : > { %s921_s13 = smov %s923_s29  ;;  %18 = sbr.rel (!%p16_p7) target bundleno = 7 (0x7), region = 87 }
  0xe1   :  { %339 = vsyncpa [#allocation4], 1 }
  0xe2   :  { %341 = vsyncpa [#allocation4 + $0x1], 1 }
  0xe3   :  { %342 = vsyncpa [#allocation7], 1 }
  0xe4   :  { %344 = vsyncpa [#allocation7 + $0x1], 1 }
  0xe5   :  { %345 = vsyncpa [#allocation5], 1 }
  0xe6   :  { %347 = vsyncpa [#allocation5 + $0x1], 1 }

</bundles_post_ra>
